<compile_context>
chip_gen: v7x
topology: tpu7x:2x2x1
jax: 0.10.0
libtpu: 0.0.40
codegen_flags: <defaults>
</compile_context>

<pallas_src>
import functools

import jax
import jax.numpy as jnp
from jax.experimental import pallas as pl
from jax.experimental.pallas import tpu as pltpu


def _mha_head_kernel(x_ref, xh_ref, w_ref, b_ref, scale_ref, shift_ref, o_ref,
                     *, matmul_dtype):
    """One grid step == (one batch block) x (one attention head).

    Block shapes:
      x_ref     : (TB, seq, n_hidden)   full-channel input (projection operand)
      xh_ref    : (1, TB, seq, d)       this head's channel slice of x (residual)
      w_ref     : (1, n_hidden, 3*d)    fused [Wq*s | Wk | Wv] columns, this head
      b_ref     : (1, 1, 3*d)           fused bias (bq pre-scaled by 1/sqrt(d))
      scale_ref : (1, 1, d)             folded BN scale = gamma / sqrt(var + eps)
      shift_ref : (1, 1, d)             folded BN shift = beta - mean * scale
      o_ref     : (1, TB, seq, d)       head-major output slab
    """
    tb, seq, n_hidden = x_ref.shape
    d = o_ref.shape[-1]

    x = x_ref[...]                                        # (TB, seq, n_hidden) f32
    x2d = x.reshape(tb * seq, n_hidden).astype(matmul_dtype)

    # Fused Q/K/V projection for this head: ONE MXU matmul (N = 3*d), f32 acc.
    w = w_ref[0]                                          # (n_hidden, 3*d) bf16
    qkv = jnp.dot(x2d, w, preferred_element_type=jnp.float32) + b_ref[0]
    qkv = jnp.maximum(qkv, 0.0)                           # ReLU

    q = qkv[:, 0 * d:1 * d].reshape(tb, seq, d)           # already * 1/sqrt(d)
    k = qkv[:, 1 * d:2 * d].reshape(tb, seq, d)
    v = qkv[:, 2 * d:3 * d].reshape(tb, seq, d)

    # Scores: batched contraction over d -- no explicit k.T / XLU transpose,
    # no scalar rescale of the (seq x seq) tensor (folded into Wq upstream).
    s = jnp.einsum('bqd,bkd->bqk',
                   q.astype(matmul_dtype), k.astype(matmul_dtype),
                   preferred_element_type=jnp.float32)

    # Numerically stable softmax; 1/sum is folded AFTER p @ v so normalization
    # costs seq*d (not seq*seq) elementwise work and uses the EUP reciprocal.
    s = s - jnp.max(s, axis=-1, keepdims=True)
    p = jnp.exp(s)                                        # unnormalized (TB, seq, seq)
    l = jnp.sum(p, axis=-1, keepdims=True)                # (TB, seq, 1)

    o = jnp.einsum('bqk,bkd->bqd',
                   p.astype(matmul_dtype), v.astype(matmul_dtype),
                   preferred_element_type=jnp.float32)
    o = o * pl.reciprocal(l, approx=True)

    # Residual + eval-mode BatchNorm1d folded into a single affine (f32).
    y = o + xh_ref[0]
    y = y * scale_ref[0] + shift_ref[0]
    o_ref[0] = y.astype(o_ref.dtype)


def multi_head_attention(x, params, *, num_heads, eps=1e-3,
                         block_b=None, matmul_dtype=jnp.bfloat16):
    bs, seq, n_hidden = x.shape
    if n_hidden % num_heads != 0:
        raise ValueError('n_hidden must be a multiple of num_heads')
    h_cnt = num_heads
    d = n_hidden // num_heads

    if block_b is None:
        block_b = bs if bs <= 8 else max(t for t in range(1, 9) if bs % t == 0)
    assert bs % block_b == 0
    nb = bs // block_b

    f32 = jnp.float32
    x = x.astype(f32)

    # ---- wrapper-side parameter prep (cheap layout plumbing) ----
    def per_head_cols(w):                  # (n_hidden, n_hidden) -> (H, n_hidden, d)
        return w.reshape(n_hidden, h_cnt, d).transpose(1, 0, 2).astype(f32)

    def per_head_vec(vec):                 # (1, n_hidden) -> (H, 1, d)
        return vec.reshape(h_cnt, d)[:, None, :].astype(f32)

    inv_sqrt_d = 1.0 / (d ** 0.5)
    # Fold the attention scale into the Q projection (ReLU commutes with a
    # positive scalar), then fuse [Wq | Wk | Wv] per head.
    w_heads = jnp.concatenate([per_head_cols(params["wq"]) * inv_sqrt_d,
                               per_head_cols(params["wk"]),
                               per_head_cols(params["wv"])],
                              axis=-1).astype(matmul_dtype)       # (H, n_hidden, 3d)
    b_heads = jnp.concatenate([per_head_vec(params["bq"]) * inv_sqrt_d,
                               per_head_vec(params["bk"]),
                               per_head_vec(params["bv"])], axis=-1)  # (H, 1, 3d)

    # Fold eval-mode BatchNorm into one affine: y * scale + shift.
    bn_scale = params["gamma"] * jax.lax.rsqrt(params["run_var"] + eps)
    bn_shift = params["beta"] - params["run_mean"] * bn_scale
    scale_heads = per_head_vec(bn_scale)                          # (H, 1, d)
    shift_heads = per_head_vec(bn_shift)                          # (H, 1, d)

    # Head-major view of x for the residual path (so the kernel never has to
    # dynamically slice the lane dimension).
    x_heads = x.reshape(bs, seq, h_cnt, d).transpose(2, 0, 1, 3)  # (H, bs, seq, d)

    kernel = functools.partial(_mha_head_kernel, matmul_dtype=matmul_dtype)

    out_heads = pl.pallas_call(
        kernel,
        out_shape=jax.ShapeDtypeStruct((h_cnt, bs, seq, d), f32),
        grid=(nb, h_cnt),    # head axis innermost: x block revisited -> DMA skipped
        in_specs=[
            pl.BlockSpec((block_b, seq, n_hidden), lambda b, h: (b, 0, 0)),   # x
            pl.BlockSpec((1, block_b, seq, d), lambda b, h: (h, b, 0, 0)),    # x per head
            pl.BlockSpec((1, n_hidden, 3 * d), lambda b, h: (h, 0, 0)),       # fused Wqkv
            pl.BlockSpec((1, 1, 3 * d), lambda b, h: (h, 0, 0)),              # fused bias
            pl.BlockSpec((1, 1, d), lambda b, h: (h, 0, 0)),                  # BN scale
            pl.BlockSpec((1, 1, d), lambda b, h: (h, 0, 0)),                  # BN shift
        ],
        out_specs=pl.BlockSpec((1, block_b, seq, d), lambda b, h: (h, b, 0, 0)),
        compiler_params=pltpu.CompilerParams(
            dimension_semantics=("parallel", "parallel")),
    )(x, x_heads, w_heads, b_heads, scale_heads, shift_heads)

    # Reassemble heads back onto the channel axis outside the kernel.
    return out_heads.transpose(1, 2, 0, 3).reshape(bs, seq, n_hidden)


def reference(x, params, *, num_heads, eps=1e-3):
    """Pure-JAX (f32) re-implementation of the PyTorch forward (eval mode)."""
    bs, seq, n_hidden = x.shape
    d = n_hidden // num_heads
    q = jax.nn.relu(x @ params["wq"] + params["bq"])
    k = jax.nn.relu(x @ params["wk"] + params["bk"])
    v = jax.nn.relu(x @ params["wv"] + params["bv"])
    q_ = jnp.concatenate(jnp.split(q, num_heads, axis=2), axis=0)
    k_ = jnp.concatenate(jnp.split(k, num_heads, axis=2), axis=0)
    v_ = jnp.concatenate(jnp.split(v, num_heads, axis=2), axis=0)
    s = jnp.matmul(q_, jnp.swapaxes(k_, 1, 2)) / (d ** 0.5)
    p = jax.nn.softmax(s, axis=-1)
    o = jnp.matmul(p, v_)
    o = jnp.concatenate(jnp.split(o, num_heads, axis=0), axis=2)
    o = o + x
    o = (o - params["run_mean"]) / jnp.sqrt(params["run_var"] + eps) \
        * params["gamma"] + params["beta"]
    return o


def init_params(key, n_hidden):
    """Deterministic init matching nn.Linear / nn.BatchNorm1d shapes."""
    ks = jax.random.split(key, 10)
    bound = 1.0 / (n_hidden ** 0.5)
    u = lambda k, shape, lo, hi: jax.random.uniform(k, shape, jnp.float32, lo, hi)
    return {
        "wq": u(ks[0], (n_hidden, n_hidden), -bound, bound),
        "bq": u(ks[1], (1, n_hidden), -bound, bound),
        "wk": u(ks[2], (n_hidden, n_hidden), -bound, bound),
        "bk": u(ks[3], (1, n_hidden), -bound, bound),
        "wv": u(ks[4], (n_hidden, n_hidden), -bound, bound),
        "bv": u(ks[5], (1, n_hidden), -bound, bound),
        # Mildly non-trivial BN parameters so the folded affine path is exercised.
        "gamma": u(ks[6], (1, n_hidden), 0.8, 1.2),
        "beta": u(ks[7], (1, n_hidden), -0.1, 0.1),
        "run_mean": u(ks[8], (1, n_hidden), -0.1, 0.1),
        "run_var": u(ks[9], (1, n_hidden), 0.8, 1.2),
    }


if __name__ == "__main__":
    bs, seq, n_hidden, num_heads = 2, 8, 32, 4   # n_hidden % num_heads == 0
    key = jax.random.PRNGKey(0)
    kx, kp = jax.random.split(key)
    x = jax.random.normal(kx, (bs, seq, n_hidden), jnp.float32)
    params = init_params(kp, n_hidden)

    out = multi_head_attention(x, params, num_heads=num_heads, eps=1e-3)
    out = jax.block_until_ready(out)

    ref = reference(x, params, num_heads=num_heads, eps=1e-3)
    assert out.shape == (bs, seq, n_hidden)
    # bf16 MXU operands + approx EUP reciprocal vs. pure-f32 reference -> loose
    # tolerance; structural bugs (head mapping, residual, BN) produce O(1) error.
    max_err = float(jnp.max(jnp.abs(out - ref)))
    assert jnp.allclose(out, ref, atol=5e-2, rtol=5e-2), f"mismatch: {max_err}"
    print("KERNEL_OK")
</pallas_src>

<mosaic_0001>
module attributes {stable_mosaic.version = 11 : i64} {
  func.func @_mha_head_kernel(%arg0: i32, %arg1: i32, %arg2: memref<2x8x32xf32, #tpu.memory_space<vmem>>, %arg3: memref<1x2x8x8xf32, #tpu.memory_space<vmem>>, %arg4: memref<1x32x24xbf16, #tpu.memory_space<vmem>>, %arg5: memref<1x1x24xf32, #tpu.memory_space<vmem>>, %arg6: memref<1x1x8xf32, #tpu.memory_space<vmem>>, %arg7: memref<1x1x8xf32, #tpu.memory_space<vmem>>, %arg8: memref<1x2x8x8xf32, #tpu.memory_space<vmem>>) attributes {dimension_semantics = [#tpu.dimension_semantics<parallel>, #tpu.dimension_semantics<parallel>], iteration_bounds = array<i64: 1, 4>, scalar_prefetch = 0 : i64, scratch_operands = 0 : i64, tpu.core_type = #tpu.core_type<tc>, window_params = [{transform_indices = @transform_0, window_bounds = array<i64: 2, 8, 32>}, {transform_indices = @transform_1, window_bounds = array<i64: 1, 2, 8, 8>}, {transform_indices = @transform_2, window_bounds = array<i64: 1, 32, 24>}, {transform_indices = @transform_3, window_bounds = array<i64: 1, 1, 24>}, {transform_indices = @transform_4, window_bounds = array<i64: 1, 1, 8>}, {transform_indices = @transform_5, window_bounds = array<i64: 1, 1, 8>}, {transform_indices = @transform_6, window_bounds = array<i64: 1, 2, 8, 8>}]} {
    %c0 = arith.constant 0 : index
    %c0_0 = arith.constant 0 : index
    %c0_1 = arith.constant 0 : index
    %0 = vector.load %arg2[%c0, %c0_0, %c0_1] : memref<2x8x32xf32, #tpu.memory_space<vmem>>, vector<2x8x32xf32>
    %1 = vector.shape_cast %0 : vector<2x8x32xf32> to vector<16x32xf32>
    %2 = arith.truncf %1 : vector<16x32xf32> to vector<16x32xbf16>
    %c0_2 = arith.constant 0 : index
    %c0_3 = arith.constant 0 : index
    %c0_4 = arith.constant 0 : index
    %3 = vector.load %arg4[%c0_2, %c0_3, %c0_4] : memref<1x32x24xbf16, #tpu.memory_space<vmem>>, vector<1x32x24xbf16>
    %4 = vector.shape_cast %3 : vector<1x32x24xbf16> to vector<32x24xbf16>
    %cst = arith.constant dense<0.000000e+00> : vector<16x24xf32>
    %5 = tpu.matmul %2, %4, %cst {dimension_numbers = #tpu.dot_dimension_numbers<[1], [0], [0], [1], [0, 0, 1, 1], [], []>} : vector<16x32xbf16>, vector<32x24xbf16>, vector<16x24xf32> -> vector<16x24xf32>
    %c0_5 = arith.constant 0 : index
    %c0_6 = arith.constant 0 : index
    %c0_7 = arith.constant 0 : index
    %6 = vector.load %arg5[%c0_5, %c0_6, %c0_7] : memref<1x1x24xf32, #tpu.memory_space<vmem>>, vector<1x1x24xf32>
    %7 = vector.shape_cast %6 : vector<1x1x24xf32> to vector<1x24xf32>
    %8 = vector.broadcast %7 : vector<1x24xf32> to vector<16x24xf32>
    %9 = arith.addf %5, %8 : vector<16x24xf32>
    %cst_8 = arith.constant 0.000000e+00 : f32
    %10 = vector.broadcast %cst_8 : f32 to vector<16x24xf32>
    %11 = arith.maximumf %9, %10 : vector<16x24xf32>
    %12 = vector.extract_strided_slice %11 {offsets = [0, 0], sizes = [16, 8], strides = [1, 1]} : vector<16x24xf32> to vector<16x8xf32>
    %13 = vector.shape_cast %12 : vector<16x8xf32> to vector<2x8x8xf32>
    %14 = vector.extract_strided_slice %11 {offsets = [0, 8], sizes = [16, 8], strides = [1, 1]} : vector<16x24xf32> to vector<16x8xf32>
    %15 = vector.shape_cast %14 : vector<16x8xf32> to vector<2x8x8xf32>
    %16 = vector.extract_strided_slice %11 {offsets = [0, 16], sizes = [16, 8], strides = [1, 1]} : vector<16x24xf32> to vector<16x8xf32>
    %17 = vector.shape_cast %16 : vector<16x8xf32> to vector<2x8x8xf32>
    %18 = arith.truncf %13 : vector<2x8x8xf32> to vector<2x8x8xbf16>
    %19 = arith.truncf %15 : vector<2x8x8xf32> to vector<2x8x8xbf16>
    "tpu.trace_start"() <{level = 10 : i32, message = "bqd,bkd->bqk"}> : () -> ()
    %cst_9 = arith.constant dense<0.000000e+00> : vector<2x8x8xf32>
    %20 = tpu.matmul %18, %19, %cst_9 {dimension_numbers = #tpu.dot_dimension_numbers<[2], [2], [1], [1], [0, 0, 0, 1, 1, 1], [0], [0]>} : vector<2x8x8xbf16>, vector<2x8x8xbf16>, vector<2x8x8xf32> -> vector<2x8x8xf32>
    "tpu.trace_stop"() : () -> ()
    %cst_10 = arith.constant dense<0xFF800000> : vector<2x8xf32>
    %21 = vector.multi_reduction <maximumf>, %20, %cst_10 [2] : vector<2x8x8xf32> to vector<2x8xf32>
    %22 = vector.shape_cast %21 : vector<2x8xf32> to vector<2x8x1xf32>
    %23 = vector.broadcast %22 : vector<2x8x1xf32> to vector<2x8x8xf32>
    %24 = arith.subf %20, %23 : vector<2x8x8xf32>
    %25 = math.exp %24 : vector<2x8x8xf32>
    %cst_11 = arith.constant dense<0.000000e+00> : vector<2x8xf32>
    %26 = vector.multi_reduction <add>, %25, %cst_11 [2] : vector<2x8x8xf32> to vector<2x8xf32>
    %27 = vector.shape_cast %26 : vector<2x8xf32> to vector<2x8x1xf32>
    %28 = arith.truncf %25 : vector<2x8x8xf32> to vector<2x8x8xbf16>
    %29 = arith.truncf %17 : vector<2x8x8xf32> to vector<2x8x8xbf16>
    "tpu.trace_start"() <{level = 10 : i32, message = "bqk,bkd->bqd"}> : () -> ()
    %cst_12 = arith.constant dense<0.000000e+00> : vector<2x8x8xf32>
    %30 = tpu.matmul %28, %29, %cst_12 {dimension_numbers = #tpu.dot_dimension_numbers<[2], [1], [1], [2], [0, 0, 0, 1, 1, 2], [0], [0]>} : vector<2x8x8xbf16>, vector<2x8x8xbf16>, vector<2x8x8xf32> -> vector<2x8x8xf32>
    "tpu.trace_stop"() : () -> ()
    %31 = tpu.reciprocal %27 {approx = true} : vector<2x8x1xf32> -> vector<2x8x1xf32>
    %32 = vector.broadcast %31 : vector<2x8x1xf32> to vector<2x8x8xf32>
    %33 = arith.mulf %30, %32 : vector<2x8x8xf32>
    %c0_13 = arith.constant 0 : index
    %c0_14 = arith.constant 0 : index
    %c0_15 = arith.constant 0 : index
    %c0_16 = arith.constant 0 : index
    %34 = vector.load %arg3[%c0_13, %c0_14, %c0_15, %c0_16] : memref<1x2x8x8xf32, #tpu.memory_space<vmem>>, vector<1x2x8x8xf32>
    %35 = vector.shape_cast %34 : vector<1x2x8x8xf32> to vector<2x8x8xf32>
    %36 = arith.addf %33, %35 : vector<2x8x8xf32>
    %c0_17 = arith.constant 0 : index
    %c0_18 = arith.constant 0 : index
    %c0_19 = arith.constant 0 : index
    %37 = vector.load %arg6[%c0_17, %c0_18, %c0_19] : memref<1x1x8xf32, #tpu.memory_space<vmem>>, vector<1x1x8xf32>
    %38 = vector.shape_cast %37 : vector<1x1x8xf32> to vector<1x8xf32>
    %39 = vector.shape_cast %38 : vector<1x8xf32> to vector<1x1x8xf32>
    %40 = vector.broadcast %39 : vector<1x1x8xf32> to vector<2x8x8xf32>
    %41 = arith.mulf %36, %40 : vector<2x8x8xf32>
    %c0_20 = arith.constant 0 : index
    %c0_21 = arith.constant 0 : index
    %c0_22 = arith.constant 0 : index
    %42 = vector.load %arg7[%c0_20, %c0_21, %c0_22] : memref<1x1x8xf32, #tpu.memory_space<vmem>>, vector<1x1x8xf32>
    %43 = vector.shape_cast %42 : vector<1x1x8xf32> to vector<1x8xf32>
    %44 = vector.shape_cast %43 : vector<1x8xf32> to vector<1x1x8xf32>
    %45 = vector.broadcast %44 : vector<1x1x8xf32> to vector<2x8x8xf32>
    %46 = arith.addf %41, %45 : vector<2x8x8xf32>
    %c0_23 = arith.constant 0 : index
    %c0_24 = arith.constant 0 : index
    %c0_25 = arith.constant 0 : index
    %c0_26 = arith.constant 0 : index
    %47 = vector.load %arg8[%c0_23, %c0_24, %c0_25, %c0_26] : memref<1x2x8x8xf32, #tpu.memory_space<vmem>>, vector<1x2x8x8xf32>
    %48 = vector.shape_cast %47 : vector<1x2x8x8xf32> to vector<2x8x8xf32>
    %49 = vector.shape_cast %46 : vector<2x8x8xf32> to vector<1x2x8x8xf32>
    tpu.vector_store %arg8[%c0_23, %c0_24, %c0_25, %c0_26], %49 {strides = array<i32>} : memref<1x2x8x8xf32, #tpu.memory_space<vmem>>, vector<1x2x8x8xf32>,
    return
  }
  func.func @transform_0(%arg0: i32, %arg1: i32) -> (i32, i32, i32) {
    %c0_i32 = arith.constant 0 : i32
    %c0_i32_0 = arith.constant 0 : i32
    %c0_i32_1 = arith.constant 0 : i32
    return %arg0, %c0_i32, %c0_i32_0 : i32, i32, i32
  }
  func.func @transform_1(%arg0: i32, %arg1: i32) -> (i32, i32, i32, i32) {
    %c0_i32 = arith.constant 0 : i32
    %c0_i32_0 = arith.constant 0 : i32
    %c0_i32_1 = arith.constant 0 : i32
    return %arg1, %arg0, %c0_i32, %c0_i32_0 : i32, i32, i32, i32
  }
  func.func @transform_2(%arg0: i32, %arg1: i32) -> (i32, i32, i32) {
    %c0_i32 = arith.constant 0 : i32
    %c0_i32_0 = arith.constant 0 : i32
    %c0_i32_1 = arith.constant 0 : i32
    return %arg1, %c0_i32, %c0_i32_0 : i32, i32, i32
  }
  func.func @transform_3(%arg0: i32, %arg1: i32) -> (i32, i32, i32) {
    %c0_i32 = arith.constant 0 : i32
    %c0_i32_0 = arith.constant 0 : i32
    %c0_i32_1 = arith.constant 0 : i32
    return %arg1, %c0_i32, %c0_i32_0 : i32, i32, i32
  }
  func.func @transform_4(%arg0: i32, %arg1: i32) -> (i32, i32, i32) {
    %c0_i32 = arith.constant 0 : i32
    %c0_i32_0 = arith.constant 0 : i32
    %c0_i32_1 = arith.constant 0 : i32
    return %arg1, %c0_i32, %c0_i32_0 : i32, i32, i32
  }
  func.func @transform_5(%arg0: i32, %arg1: i32) -> (i32, i32, i32) {
    %c0_i32 = arith.constant 0 : i32
    %c0_i32_0 = arith.constant 0 : i32
    %c0_i32_1 = arith.constant 0 : i32
    return %arg1, %c0_i32, %c0_i32_0 : i32, i32, i32
  }
  func.func @transform_6(%arg0: i32, %arg1: i32) -> (i32, i32, i32, i32) {
    %c0_i32 = arith.constant 0 : i32
    %c0_i32_0 = arith.constant 0 : i32
    %c0_i32_1 = arith.constant 0 : i32
    return %arg1, %arg0, %c0_i32, %c0_i32_0 : i32, i32, i32, i32
  }
}

</mosaic_0001>

<bundles_post_ra>
// kernel: tpu_custom_call.1
= control target key start
LH: loop header
LB: loop body
LE: loop exit
PB: predicated region body
PF: predicated region fallthrough
CT: control target
= control target key end

     0   :  { %11 = vsyncpa [#allocation3], 0  ;;  %s1267_s0 = inlined_call_operand.vmem [shape: f32[2,8,32], index: 0, kind: input, shape index: {}]   ;;  %s1268_s1 = inlined_call_operand.vmem [shape: f32[4,2,8,8], index: 1, kind: input, shape index: {}]   ;;  %s1269_s2 = inlined_call_operand.vmem [shape: bf16[4,32,24], index: 2, kind: input, shape index: {}]   ;;  %s1270_s3 = inlined_call_operand.vmem [shape: f32[4,1,24], index: 3, kind: input, shape index: {}]   ;;  %s1271_s4 = inlined_call_operand.vmem [shape: f32[4,1,8], index: 4, kind: input, shape index: {}]   ;;  %s1272_s5 = inlined_call_operand.vmem [shape: f32[4,1,8], index: 5, kind: input, shape index: {}]   ;;  %s1273_s6 = inlined_call_operand.hbm [shape: f32[4,2,8,8], index: 6, kind: output, shape index: {}]  }
   0x1   :  { %13 = vsyncpa [#allocation3 + $0x1], 0  ;;  %s1099_s21 = smov 0   ;;  %s1101_s22 = smov 0  }
   0x2   :  { %s1103_s23 = smov 0   ;;  %s1105_s24 = smov 0  }
   0x3   :  { %s1107_s25 = smov 0   ;;  %s1109_s26 = smov 0  }
   0x4 LB: > { %s834_s27 = sadd.s32 4294967295, %s1055_s26   ;;  %s835_s28 = sadd.s32 4294967294, %s1055_s26   ;;  %s1055_s26 = sphi %s1109_s26, %s19_s26   ;;  %s1051_s25 = sphi %s1107_s25, %s1280_s25   ;;  %s1047_s24 = sphi %s1105_s24, %s1279_s24   ;;  %s1043_s23 = sphi %s1103_s23, %s1278_s23   ;;  %s1039_s22 = sphi %s1101_s22, %s1277_s22   ;;  %s1035_s21 = sphi %s1099_s21, %s1276_s21  }
   0x5   : > { %s28_s29 = sadd.s32 1, %s1051_s25  ;;  %s198_s30 = sadd.s32 1, %s1043_s23 }
   0x6   : > { %p29_p0 = scmp.ge.s32.totalorder %s28_s29, 4  ;;  %p208_p1 = scmp.ne.s32.totalorder %s1043_s23, %s1039_s22 }
   0x7   : > { %p209_p2 = scmp.eq.s32.totalorder %s834_s27, 3  ;;  %p214_p3 = scmp.ne.s32.totalorder %s1039_s22, %s1035_s21 }
   0x8   : > { %s1282_s29 = smov (%p29_p0, %s28_s29), 0  ;;  %p215_p5 = scmp.eq.s32.totalorder %s835_s28, 3 }
   0x9   : > { %p1139_p4 = por %p209_p2, %p208_p1  ;;  %s193_s8 = ssub.s32 %s1051_s25, %s1282_s29 }
   0xa   : > { %p839_p6 = scmp.ge.s32.totalorder %s1055_s26, 1  ;;  %p196_p7 = scmp.eq.s32.totalorder %s193_s8, 0 }
   0xb   : > { %p1146_p8 = por %p215_p5, %p214_p3  ;;  %p281_p9 = scmp.lt.s32.totalorder %s1055_s26, 5 }
   0xc   : > { %s1152_s10 = scalar_select %p196_p7, %s1043_s23, %s198_s30  }
   0xd   : > { %p282_p10 = pnand %p839_p6, %p281_p9 }
   0xe   : > { %p341_p11 = scmp.lt.s32.totalorder (!%p282_p10), %s1047_s24, 3  ;;  %v1057_v0 = vmov (!%p282_p10), 0.0   ;;  %vm1058_vm0 = vmmov (!%p282_p10), 0   ;;  %v366_v3 = vld [vmem:[%s1267_s0] sm:$0xff] (!%p282_p10)  ;;  %v367_v4 = vld [vmem:[%s1267_s0 + $0x8] sm:$0xff] (!%p282_p10)  ;;  %vm392_vm1 = vcmask (!%p282_p10), 261120  }
   0xf   : > { %285 = sbr.rel (%p282_p10) target bundleno = 986 (0x3da), region = 44  ;;  %874 = vmatprep.subr.bf16.mxu0 (!%p282_p10), %v1057_v0  ;;  %878 = vmatprep.mubr.msk.bf16.mxu0 (!%p282_p10), %vm1058_vm0, %v1057_v0  ;;  %v368_v5 = vpack.c.bf16 (!%p282_p10), %v367_v4, %v366_v3  ;;  %s1059_s30 = smov (!%p282_p10), 120   ;;  %vm444_vm2 = vcmask (!%p282_p10), 64512   ;;  %vm565_vm3 = vcmask (!%p282_p10), 1043456  }
  0x10   : > { %882 = vmatprep.subr.bf16.mxu1 (!%p282_p10), %v1057_v0  ;;  %884 = vmatprep.mubr.msk.bf16.mxu1 (!%p282_p10), %vm1058_vm0, %v1057_v0  ;;  %s1060_s8 = smov (!%p282_p10), 112   ;;  %s331_s19 = sand.u32 (!%p282_p10), 1, %s1039_s22  }
  0x11   : > { %s1061_s17 = smov (!%p282_p10), [#allocation2]  }
  0x16   : > { %s1157_s11 = scalar_select %p341_p11, %s1047_s24, 3 }
  0x18   : > { %s860_s12 = sshll.u32 %s1157_s11, 4  ;;  %s357_s28 = scalar_lea.vmem %s1270_s3, %s1157_s11 }
  0x19   : > { %s354_s15 = scalar_lea.vmem %s1269_s2, %s860_s12  ;;  %v845_v6 = vld [vmem:[%s357_s28] ss:$0 sm:$0xff]  ;;  %s360_s18 = scalar_lea.vmem %s1271_s4, %s1157_s11 }
  0x1a   : > { %v967_v1 = vld [vmem:[%s354_s15] sm:$0xff]   ;;  %v968_v2 = vld [vmem:[%s354_s15 + $0x8] sm:$0xff]   ;;  %s348_s15 = scalar_lea.vmem %s1268_s1, %s860_s12  ;;  %s363_s28 = scalar_lea.vmem %s1272_s5, %s1157_s11 }
  0x1b   : > { %875 = vmatpush3.bf16.msra.mxu0 %v967_v1  ;;  %v661_v51 = vld [vmem:[%s348_s15] sm:$0xff]  ;;  %v662_v61 = vld [vmem:[%s348_s15 + $0x8] sm:$0xff]  ;;  %s862_s11 = sshll.u32 %s1047_s24, 8  ;;  %s1221_s24 = scalar_lea.sflag [#allocation3], %s331_s19 }
  0x1c   : > { %876 = vmatprep.subr.bf16.mxu0 %v1057_v0  ;;  %v853_v54 = vld [vmem:[%s360_s18] ss:$0 sm:$0xff]  ;;  %s1214_s16 = scalar_lea.hbm %s1273_s6, %s862_s11  ;;  %s981_s18 = sshll.u32 %s1061_s17, 4  ;;  %s982_s18 = int_to_ptr.vmem [resolvable:$false] %s981_s18 }
  0x1d   : > { %v854_v59 = vld [vmem:[%s363_s28] ss:$0 sm:$0xff]  ;;  %s983_s20 = scalar_lea.vmem %s982_s18, 512 }
  0x1f   : > { %877 = vmatpush3.bf16.msra.mxu0 %v968_v2 }
  0x20   : > { %888 = vmatprep.subr.bf16.mxu0 %v1057_v0 }
  0x22   : > { %879 = vmatmul.mubr.msk.bf16.vlgmr.msra.gmra.mrb[0].mxu0 %vm392_vm1, %v368_v5 }
  0x23   : > { %890 = vmatprep.mubr.msk.bf16.mxu0 %vm1058_vm0, %v1057_v0 }
  0xf5   : > { %v430_v7 = vpop.f32.mrb[0].mxu0 }
  0xf6   : > { %v431_v8 = vadd.f32 %v845_v6, %v430_v7  ;;  %v880_v9 = vpop.f32.mrb[1].mxu0 }
  0xf7   : > { %v433_v10 = vpop.f32.mrb[2].mxu0 }
  0xf8   : > { %v437_v11 = vmax.f32 %v431_v8, 0.0  ;;  %v434_v12 = vadd.f32 %v845_v6, %v433_v10  ;;  %v881_v13 = vpop.f32.mrb[3].mxu0 }
  0xfa   : > { %v439_v14 = vpack.c.bf16 %v437_v11, %v437_v11  ;;  %v438_v15 = vmax.f32 %v434_v12, 0.0 }
  0xfc   : > { %442 = vrot.lane.b32.xlu0 %v439_v14, %s1059_s30  ;;  %v440_v16 = vpack.c.bf16 %v438_v15, %v438_v15 }
 0x100   : > { %492 = vrot.lane.b32.xlu0 %v440_v16, %s1059_s30  ;;  %s840_s30 = sshll.u32 %s331_s19, 4 }
 0x101   : > { %s333_s12 = scalar_lea.vmem [#allocation2], %s840_s30 }
 0x104   : > { %560 = vrot.lane.b32.xlu0 %v439_v14, %s1060_s8 }
 0x16e   : > { %v443_v17 = vpop.permute.xlu0 %442 }
 0x16f   : > { %v449_v18 = vsel %vm444_vm2, %v443_v17, 0 }
 0x170   : > { %883 = vmatpush3.bf16.xpose.msra.mxu1 %v449_v18 }
 0x171   : > { %894 = vmatprep.subr.bf16.mxu1 %v1057_v0 }
 0x172   : > { %v493_v19 = vpop.permute.xlu0 %492 }
 0x173   : > { %v498_v20 = vsel %vm444_vm2, %v493_v19, 0 }
 0x174   : > { %889 = vmatpush3.bf16.xpose.msra.mxu0 %v498_v20 }
 0x175   : > { %900 = vmatprep.subr.bf16.mxu0 %v1057_v0 }
 0x176   : > { %v561_v21 = vpop.permute.xlu0 %560 }
 0x177   : > { %v567_v22 = vsel %vm565_vm3, %v561_v21, 0  ;;  %885 = vmatmul.mubr.msk.bf16.vlgmr.msra.gmra.mrb[0].mxu1 %vm444_vm2, %v439_v14 }
 0x178   : > { %895 = vmatpush3.bf16.msra.mxu1 %v567_v22  ;;  %896 = vmatprep.mubr.msk.bf16.mxu1 %vm1058_vm0, %v1057_v0 }
 0x17b   : > { %891 = vmatmul.mubr.msk.bf16.vlgmr.msra.gmra.mrb[4].mxu0 %vm444_vm2, %v440_v16 }
 0x17c   : > { %902 = vmatprep.mubr.msk.bf16.mxu0 %vm1058_vm0, %v1057_v0 }
 0x24a   : > { %v485_v23 = vpop.f32.mrb[0].mxu1 }
 0x24b   : > { %v886_v24 = vpop.f32.mrb[1].mxu1  ;;  %v540_v25 = vsel %vm444_vm2, %v485_v23, -inf }
 0x24c   : > { %541 = vmax.xlane.f32.xlu1 %v540_v25  ;;  %v488_v26 = vpop.f32.mrb[2].mxu1 }
 0x24d   : > { %v887_v27 = vpop.f32.mrb[3].mxu1 }
 0x24e   : > { %v534_v28 = vpop.f32.mrb[4].mxu0 }
 0x24f   : > { %v892_v29 = vpop.f32.mrb[5].mxu0  ;;  %v543_v30 = vsel %vm444_vm2, %v534_v28, -inf }
 0x250   : > { %544 = vmax.xlane.f32.xlu1 %v543_v30  ;;  %v537_v31 = vpop.f32.mrb[6].mxu0 }
 0x251   : > { %v893_v32 = vpop.f32.mrb[7].mxu0 }
 0x261   : > { %609 = vrot.lane.b32.xlu1 %v440_v16, %s1060_s8  ;;  %s701_s8 = sshll.u32 %s333_s12, 4  ;;  %s1216_s8 = int_to_ptr.vmem [resolvable:$true] %s701_s8 }
 0x262   : > { %s977_s15 = scalar_lea.vmem %s1216_s8, 256  ;;  %p984_p1 = scmp.lt.s32.totalorder %s1216_s8, %s982_s18 }
 0x263   : > { %p978_p12 = scmp.ne.s32.totalorder %s1216_s8, %s977_s15  ;;  %p985_p2 = scmp.lt.s32.totalorder %s983_s20, %s977_s15 }
 0x265   : > { %p979_p13 = pnand %p978_p12, %p1139_p4  ;;  %p986_p3 = por %p985_p2, %p984_p1 }
 0x267   : > { %p980_p0 = pneg %p979_p13 }
 0x269   : > { %p987_p5 = pnand %p986_p3, %p980_p0 }
 0x2d9   : > { %v542_v33 = vpop.xlane.xlu1 %541 }
 0x2da   : > { %v546_v34 = vsub.f32 %v485_v23, %v542_v33 }
 0x2dc   : > { %v548_v35 = vmul.f32 1.442695, %v546_v34 }
 0x2dd   : > { %v545_v36 = vpop.xlane.xlu1 %544 }
 0x2de   : > { %969 = vpow2.f32 %v548_v35  ;;  %v547_v37 = vsub.f32 %v534_v28, %v545_v36 }
 0x2e0   : > { %v550_v38 = vmul.f32 1.442695, %v547_v37 }
 0x2e1   : > { %v610_v39 = vpop.permute.xlu1 %609 }
 0x2e2   : > { %971 = vpow2.f32 %v550_v38  ;;  %v615_v40 = vsel %vm565_vm3, %v610_v39, 0 }
 0x2e3   : > { %901 = vmatpush3.bf16.msra.mxu0 %v615_v40 }
 0x2e8   : > { %v970_v41 = vpop.eup %969 }
 0x2e9   : > { %v552_v42 = vsel %vm444_vm2, %v970_v41, 0.0  ;;  %v558_v43 = vpack.c.bf16 %v970_v41, %v970_v41 }
 0x2ea   : > { %553 = vadd.xlane.f32.xlu0 %v552_v42 }
 0x2eb   : > { %897 = vmatmul.mubr.msk.bf16.vlgmr.msra.gmra.mrb[4].mxu1 %vm444_vm2, %v558_v43 }
 0x2ec   : > { %v972_v44 = vpop.eup %971 }
 0x2ed   : > { %v555_v45 = vsel %vm444_vm2, %v972_v44, 0.0  ;;  %v559_v46 = vpack.c.bf16 %v972_v44, %v972_v44 }
 0x2ee   : > { %556 = vadd.xlane.f32.xlu1 %v555_v45 }
 0x2ef   : > { %903 = vmatmul.mubr.msk.bf16.vlgmr.msra.gmra.mrb[8].mxu0 %vm444_vm2, %v559_v46 }
 0x377   : > { %v554_v47 = vpop.xlane.xlu0 %553 }
 0x378   : > { %973 = vrcp.f32 %v554_v47 }
 0x37b   : > { %v557_v48 = vpop.xlane.xlu1 %556 }
 0x37c   : > { %975 = vrcp.f32 %v557_v48 }
 0x382   : > { %v974_v49 = vpop.eup %973 }
 0x386   : > { %v976_v58 = vpop.eup %975 }
 0x3be   : > { %v603_v50 = vpop.f32.mrb[4].mxu1 }
 0x3bf   : > { %v659_v52 = vmul.f32 %v974_v49, %v603_v50  ;;  %v898_v53 = vpop.f32.mrb[5].mxu1 }
 0x3c0   : > { %v606_v55 = vpop.f32.mrb[6].mxu1 }
 0x3c1   : > { %v663_v56 = vadd.f32 %v661_v51, %v659_v52  ;;  %v899_v57 = vpop.f32.mrb[7].mxu1 }
 0x3c2   : > { %v651_v60 = vpop.f32.mrb[8].mxu0 }
 0x3c3   : > { %v672_v62 = vmul.f32 %v853_v54, %v663_v56  ;;  %v660_v63 = vmul.f32 %v976_v58, %v651_v60  ;;  %v904_v0 = vpop.f32.mrb[9].mxu0 }
 0x3c4   : > { %v654_v1 = vpop.f32.mrb[10].mxu0 }
 0x3c5   : > { %v681_v2 = vadd.f32 %v854_v59, %v672_v62  ;;  %v664_v3 = vadd.f32 %v662_v61, %v660_v63  ;;  %v905_v4 = vpop.f32.mrb[11].mxu0 }
 0x3c7   : > { %683 = vst.msk [vmem:[%s333_s12] sm:$0xff] %vm444_vm2, %v681_v2  ;;  %v673_v5 = vmul.f32 %v853_v54, %v664_v3 }
 0x3c9   : > { %v682_v6 = vadd.f32 %v854_v59, %v673_v5 }
 0x3cb   : > { %684 = vst.msk [vmem:[%s333_s12 + $0x8] sm:$0xff] %vm444_vm2, %v682_v6 }
 0x3cc   : > { %990 = shalt.err (!%p987_p5)
}
 0x3cd   : > { %s991_s19 = scalar_lea.hbm %s1214_s16, 256  ;;  %s995_s30 = scalar_lea.hbm %s1273_s6, 1024 }
 0x3ce   : > { %p992_p6 = scmp.ne.s32.totalorder %s1214_s16, %s991_s19  ;;  %p996_p10 = scmp.lt.u32.totalorder %s1214_s16, %s1273_s6 }
 0x3cf   : > { %p997_p11 = scmp.lt.u32.totalorder %s995_s30, %s991_s19  ;;  %p999_p13 = scmp.lt.u32.totalorder %s991_s19, %s1214_s16 }
 0x3d0   : > { %p993_p7 = pnand %p992_p6, %p1139_p4 }
 0x3d1   : > { %p998_p12 = por %p997_p11, %p996_p10 }
 0x3d2   : > { %p994_p9 = pneg %p993_p7 }
 0x3d3   : > { %p1000_p0 = por %p999_p13, %p998_p12 }
 0x3d5   : > { %p1001_p1 = pnand %p1000_p0, %p994_p9 }
 0x3d7   : > { %1004 = shalt.err (!%p1001_p1)
}
 0x3d8   : > { %s1062_s13 = smov 128   ;;  %s1063_s14 = smov 8  }
 0x3d9   : > { %906 = dma.vmem_to_hbm [thread:$0]  (%p1139_p4), %s1216_s8, 256, %s1214_s16, %s1221_s24, %s1062_s13, %s1062_s13, %s1063_s14  }
 0x3da PF: > { %p912_p2 = scmp.ge.s32.totalorder %s1055_s26, 2  ;;  %s716_s15 = sand.u32 1, %s1035_s21  }
 0x3db   : > { %s717_s17 = scalar_lea.sflag [#allocation3], %s716_s15 }
 0x3dc   : > { %p909_p3 = pnand %p912_p2, %p1146_p8 }
 0x3de   : > { %1030 = dma.done.wait (!%p909_p3), %s717_s17, 256  }
 0x3df   : > { %1032 = vsyncadd (!%p909_p3), %s717_s17, 4294967040  ;;  %s19_s26 = sadd.s32 1, %s1055_s26   ;;  %s1276_s21 = smov %s1039_s22 }
 0x3e0   : > { %p16_p5 = scmp.ge.s32.totalorder %s19_s26, 6   ;;  %s1277_s22 = smov %s1043_s23 }
 0x3e1   : > { %s1278_s23 = smov %s1152_s10  ;;  %s1279_s24 = smov %s1051_s25 }
 0x3e2   : > { %s1280_s25 = smov %s1282_s29  ;;  %18 = sbr.rel (!%p16_p5) target bundleno = 4 (0x4), region = 94 }
 0x3e9   :  { %722 = vsyncpa [#allocation3], 1 }
 0x3ea   :  { %724 = vsyncpa [#allocation3 + $0x1], 1 }

</bundles_post_ra>
